<compile_context>
chip_gen: v5e
topology: v5e:2x2
jax: 0.10.0
libtpu: 0.0.40
codegen_flags: <defaults>
</compile_context>

<pallas_src>
import numpy as np

import jax
import jax.numpy as jnp
from jax import lax
from jax.experimental import pallas as pl
from jax.experimental.pallas import tpu as pltpu

# ----------------------------- architecture constants -----------------------------
BN_EPS = 1e-5
GROWTH = 32
BN_SIZE = 4
BLOCK_CONFIG = (6, 12, 48, 32)          # densenet201
NUM_INIT_FEATURES = 64
NUM_CLASSES = 10                        # get_num_classes -> mnist/cifar10
HEAD_PAD = 128                          # lane-dense classifier width (sliced to 10)
STEM_K_PAD = 256                        # 7*7*3 = 147 padded to 2*128
ROW_TILE = 128                          # rows per grid step (raise to 256-512 for big B)

_GRID_PARAMS = pltpu.CompilerParams(
    dimension_semantics=("parallel",), vmem_limit_bytes=32 << 20)
_NOGRID_PARAMS = pltpu.CompilerParams(vmem_limit_bytes=32 << 20)


# --------------------------------- Pallas kernels ----------------------------------
def _bottleneck_kernel(x_ref, s1_ref, t1_ref, w1_ref, s2_ref, t2_ref, o_ref):
    # norm1 -> relu1 -> conv1(1x1) -> norm2 -> relu2   (dense-layer first half)
    a = jnp.maximum(x_ref[...] * s1_ref[...] + t1_ref[...], 0.0)
    h = jnp.dot(a.astype(jnp.bfloat16), w1_ref[...],
                preferred_element_type=jnp.float32)
    o_ref[...] = jnp.maximum(h * s2_ref[...] + t2_ref[...], 0.0)


def _matmul_kernel(x_ref, w_ref, o_ref):
    # 3x3 conv over im2col patches (input already BN+ReLU'd and zero-padded)
    o_ref[...] = jnp.dot(x_ref[...].astype(jnp.bfloat16), w_ref[...],
                         preferred_element_type=jnp.float32)


def _bn_relu_matmul_kernel(x_ref, s_ref, t_ref, w_ref, o_ref):
    # transition: norm -> relu -> conv1x1
    a = jnp.maximum(x_ref[...] * s_ref[...] + t_ref[...], 0.0)
    o_ref[...] = jnp.dot(a.astype(jnp.bfloat16), w_ref[...],
                         preferred_element_type=jnp.float32)


def _matmul_bn_relu_kernel(x_ref, w_ref, s_ref, t_ref, o_ref):
    # stem: conv0 (im2col matmul) -> norm0 -> relu0
    h = jnp.dot(x_ref[...].astype(jnp.bfloat16), w_ref[...],
                preferred_element_type=jnp.float32)
    o_ref[...] = jnp.maximum(h * s_ref[...] + t_ref[...], 0.0)


def _max_reduce_kernel(x_ref, o_ref):
    # max over leading axis (maxpool 3x3/2 over 9 shifted views)
    acc = x_ref[0]
    for i in range(1, x_ref.shape[0]):
        acc = jnp.maximum(acc, x_ref[i])
    o_ref[...] = acc


def _mean_reduce_kernel(x_ref, o_ref):
    # mean over leading axis (avgpool 2x2/2 over 4 shifted views)
    acc = x_ref[0]
    for i in range(1, x_ref.shape[0]):
        acc = acc + x_ref[i]
    o_ref[...] = acc * (1.0 / x_ref.shape[0])


def _head_kernel(x_ref, s_ref, t_ref, w_ref, b_ref, o_ref):
    # norm5 -> relu -> global average pool -> Linear (lane-padded to 128)
    x = x_ref[...]                      # [B, HW, C]
    hw = x.shape[1]
    acc = jnp.zeros((x.shape[0], x.shape[2]), jnp.float32)
    for i in range(hw):
        acc = acc + jnp.maximum(x[:, i, :] * s_ref[...] + t_ref[...], 0.0)
    pooled = acc * (1.0 / hw)
    o_ref[...] = jnp.dot(pooled.astype(jnp.bfloat16), w_ref[...],
                         preferred_element_type=jnp.float32) + b_ref[...]


# ------------------------------- pallas_call wrappers -------------------------------
def _pad_rows(x, tm=ROW_TILE):
    m = x.shape[0]
    mp = ((m + tm - 1) // tm) * tm
    if mp != m:
        x = jnp.pad(x, ((0, mp - m), (0, 0)))
    return x, m


def _row_call(kernel, out_cols, x, *operands):
    """Row-tiled pallas_call: x is tiled over rows; all other operands stay resident."""
    xp, m = _pad_rows(x)
    mp, k = xp.shape
    in_specs = [pl.BlockSpec((ROW_TILE, k), lambda i: (i, 0))]
    for op in operands:
        r, c = op.shape
        in_specs.append(pl.BlockSpec((r, c), lambda i: (0, 0)))
    flops = 2 * mp * k * out_cols
    bytes_accessed = (xp.size * xp.dtype.itemsize + mp * out_cols * 4
                      + sum(int(op.size) * op.dtype.itemsize for op in operands))
    out = pl.pallas_call(
        kernel,
        out_shape=jax.ShapeDtypeStruct((mp, out_cols), jnp.float32),
        grid=(mp // ROW_TILE,),
        in_specs=in_specs,
        out_specs=pl.BlockSpec((ROW_TILE, out_cols), lambda i: (i, 0)),
        compiler_params=_GRID_PARAMS,
        cost_estimate=pl.CostEstimate(flops=int(flops), transcendentals=0,
                                      bytes_accessed=int(bytes_accessed)),
    )(xp, *operands)
    return out[:m]


@jax.jit
def bottleneck(x, s1, t1, w1, s2, t2):
    return _row_call(_bottleneck_kernel, w1.shape[1], x, s1, t1, w1, s2, t2)


@jax.jit
def conv_matmul(x, w):
    return _row_call(_matmul_kernel, w.shape[1], x, w)


@jax.jit
def bn_relu_matmul(x, s, t, w):
    return _row_call(_bn_relu_matmul_kernel, w.shape[1], x, s, t, w)


@jax.jit
def matmul_bn_relu(x, w, s, t):
    return _row_call(_matmul_bn_relu_kernel, w.shape[1], x, w, s, t)


@jax.jit
def pool_max(x):      # x: [9, M, C]
    return pl.pallas_call(
        _max_reduce_kernel,
        out_shape=jax.ShapeDtypeStruct(x.shape[1:], jnp.float32),
        in_specs=[pl.BlockSpec(memory_space=pltpu.MemorySpace.VMEM)],
        out_specs=pl.BlockSpec(memory_space=pltpu.MemorySpace.VMEM),
        compiler_params=_NOGRID_PARAMS,
    )(x)


@jax.jit
def pool_mean(x):     # x: [4, M, C]
    return pl.pallas_call(
        _mean_reduce_kernel,
        out_shape=jax.ShapeDtypeStruct(x.shape[1:], jnp.float32),
        in_specs=[pl.BlockSpec(memory_space=pltpu.MemorySpace.VMEM)],
        out_specs=pl.BlockSpec(memory_space=pltpu.MemorySpace.VMEM),
        compiler_params=_NOGRID_PARAMS,
    )(x)


@jax.jit
def head(x, s, t, w, b):   # x: [B, HW, C]
    return pl.pallas_call(
        _head_kernel,
        out_shape=jax.ShapeDtypeStruct((x.shape[0], HEAD_PAD), jnp.float32),
        in_specs=[pl.BlockSpec(memory_space=pltpu.MemorySpace.VMEM)] * 5,
        out_specs=pl.BlockSpec(memory_space=pltpu.MemorySpace.VMEM),
        compiler_params=_NOGRID_PARAMS,
    )(x, s, t, w, b)


# ----------------------------------- forward pass -----------------------------------
def _run_dense_block(x, layers, c0):
    B, H, W, _ = x.shape
    m = B * H * W
    c_final = c0 + len(layers) * GROWTH
    # channel-padded feature buffer: every layer of the block sees the same width,
    # not-yet-written channels are zero and their BN scales / weight rows are zero.
    buf = jnp.zeros((B, H, W, c_final), jnp.float32).at[..., :c0].set(x)
    for i, lp in enumerate(layers):
        bott = bottleneck(buf.reshape(m, c_final),
                          lp["s1"], lp["t1"], lp["w1"], lp["s2"], lp["t2"])  # [m, 128]
        a = bott.reshape(B, H, W, BN_SIZE * GROWTH)
        apad = jnp.pad(a, ((0, 0), (1, 1), (1, 1), (0, 0)))   # conv2 zero padding
        patches = jnp.concatenate(
            [apad[:, dy:dy + H, dx:dx + W, :] for dy in range(3) for dx in range(3)],
            axis=-1)                                          # [B,H,W,1152]
        new = conv_matmul(patches.reshape(m, 9 * BN_SIZE * GROWTH), lp["w2"])  # [m, 32]
        buf = buf.at[..., c0 + i * GROWTH:c0 + (i + 1) * GROWTH].set(
            new.reshape(B, H, W, GROWTH))
    return buf


def _run_transition(x, tp):
    B, H, W, C = x.shape
    y = bn_relu_matmul(x.reshape(B * H * W, C), tp["s"], tp["t"], tp["w"])
    cc = tp["w"].shape[1]
    y = y.reshape(B, H, W, cc)
    hh, ww = H // 2, W // 2
    views = jnp.stack([y[:, dy::2, dx::2, :] for dy in range(2) for dx in range(2)],
                      axis=0)
    p = pool_mean(views.reshape(4, B * hh * ww, cc))
    return p.reshape(B, hh, ww, cc)


def densenet201_forward(x_nchw, kp):
    """Eval-mode DenseNet-201 forward.  x_nchw: [B,3,H,W] f32 -> logits [B, NUM_CLASSES]."""
    x = jnp.transpose(x_nchw, (0, 2, 3, 1)).astype(jnp.float32)   # NHWC
    B, H, W, _ = x.shape

    # stem: conv0 7x7 / stride 2 / pad 3  (+ norm0 + relu0), im2col + Pallas matmul
    ho, wo = H // 2, W // 2
    xp = jnp.pad(x, ((0, 0), (3, 3), (3, 3), (0, 0)))
    patches = jnp.concatenate(
        [xp[:, ky:ky + 2 * ho - 1:2, kx:kx + 2 * wo - 1:2, :]
         for ky in range(7) for kx in range(7)], axis=-1)
    patches = patches.reshape(B * ho * wo, 7 * 7 * 3)
    patches = jnp.pad(patches, ((0, 0), (0, STEM_K_PAD - 7 * 7 * 3)))
    h = matmul_bn_relu(patches, kp["stem_w"], kp["stem_s"], kp["stem_t"])
    h = h.reshape(B, ho, wo, NUM_INIT_FEATURES)

    # pool0: maxpool 3x3 / stride 2 / pad 1  (9 shifted stride-2 views + Pallas max)
    hp, wq = ho // 2, wo // 2
    hpad = jnp.pad(h, ((0, 0), (1, 1), (1, 1), (0, 0)), constant_values=-jnp.inf)
    views = jnp.stack(
        [hpad[:, dy:dy + 2 * hp - 1:2, dx:dx + 2 * wq - 1:2, :]
         for dy in range(3) for dx in range(3)], axis=0)
    h = pool_max(views.reshape(9, B * hp * wq, NUM_INIT_FEATURES))
    h = h.reshape(B, hp, wq, NUM_INIT_FEATURES)

    # dense blocks + transitions
    c = NUM_INIT_FEATURES
    for bi, layers in enumerate(kp["blocks"]):
        h = _run_dense_block(h, layers, c)
        c = c + len(layers) * GROWTH
        if bi < len(kp["transitions"]):
            h = _run_transition(h, kp["transitions"][bi])
            c //= 2

    # norm5 + relu + global avg pool + classifier (lane-padded head, sliced to 10)
    Bf, Hf, Wf, Cf = h.shape
    logits = head(h.reshape(Bf, Hf * Wf, Cf), kp["norm5_s"], kp["norm5_t"],
                  kp["cls_w"], kp["cls_b"])
    return logits[:, :NUM_CLASSES]


# ---------------------------- parameters (random, deterministic) ---------------------
def init_densenet201_params(seed=0):
    rng = np.random.RandomState(seed)

    def conv_hwio(kh, kw, cin, cout):
        fan_in = kh * kw * cin
        return (rng.randn(kh, kw, cin, cout) * np.sqrt(2.0 / fan_in)).astype(np.float32)

    def bn(c):
        return dict(gamma=(1.0 + 0.05 * rng.randn(c)).astype(np.float32),
                    beta=(0.05 * rng.randn(c)).astype(np.float32),
                    mean=(0.05 * rng.randn(c)).astype(np.float32),
                    var=(1.0 + 0.1 * np.abs(rng.randn(c))).astype(np.float32))

    p = dict(conv0=conv_hwio(7, 7, 3, NUM_INIT_FEATURES), norm0=bn(NUM_INIT_FEATURES),
             blocks=[], transitions=[])
    c = NUM_INIT_FEATURES
    for bi, n_layers in enumerate(BLOCK_CONFIG):
        layers = []
        for i in range(n_layers):
            cin = c + i * GROWTH
            layers.append(dict(norm1=bn(cin),
                               conv1=conv_hwio(1, 1, cin, BN_SIZE * GROWTH),
                               norm2=bn(BN_SIZE * GROWTH),
                               conv2=conv_hwio(3, 3, BN_SIZE * GROWTH, GROWTH)))
        p["blocks"].append(layers)
        c += n_layers * GROWTH
        if bi < len(BLOCK_CONFIG) - 1:
            p["transitions"].append(dict(norm=bn(c), conv=conv_hwio(1, 1, c, c // 2)))
            c //= 2
    p["norm5"] = bn(c)
    p["classifier_w"] = (rng.randn(c, NUM_CLASSES) / np.sqrt(c)).astype(np.float32)
    p["classifier_b"] = (0.01 * rng.randn(NUM_CLASSES)).astype(np.float32)
    return p


def _bn_scale_shift(bn):
    scale = (bn["gamma"] / np.sqrt(bn["var"] + BN_EPS)).astype(np.float32)
    shift = (bn["beta"] - bn["mean"] * scale).astype(np.float32)
    return scale, shift


def prep_kernel_params(p):
    """Kernel-side params: BN -> (scale, shift), bf16 weights, channel/lane padding."""
    kp = {}
    # stem (contraction padded 147 -> 256)
    w0 = p["conv0"].reshape(7 * 7 * 3, NUM_INIT_FEATURES)
    w0 = np.pad(w0, ((0, STEM_K_PAD - w0.shape[0]), (0, 0)))
    s0, t0 = _bn_scale_shift(p["norm0"])
    kp["stem_w"] = jnp.asarray(w0).astype(jnp.bfloat16)
    kp["stem_s"] = jnp.asarray(s0[None, :])
    kp["stem_t"] = jnp.asarray(t0[None, :])
    # dense blocks: pad each layer's channel dim to the block's final width
    kp["blocks"] = []
    c = NUM_INIT_FEATURES
    for bi, layers in enumerate(p["blocks"]):
        c_final = c + len(layers) * GROWTH
        kl = []
        for i, lp in enumerate(layers):
            cin = c + i * GROWTH
            s1, t1 = _bn_scale_shift(lp["norm1"])
            s2, t2 = _bn_scale_shift(lp["norm2"])
            s1p = np.zeros((1, c_final), np.float32); s1p[0, :cin] = s1
            t1p = np.zeros((1, c_final), np.float32); t1p[0, :cin] = t1
            w1p = np.zeros((c_final, BN_SIZE * GROWTH), np.float32)
            w1p[:cin] = lp["conv1"][0, 0]
            w2 = lp["conv2"].reshape(9 * BN_SIZE * GROWTH, GROWTH)
            kl.append(dict(s1=jnp.asarray(s1p), t1=jnp.asarray(t1p),
                           w1=jnp.asarray(w1p).astype(jnp.bfloat16),
                           s2=jnp.asarray(s2[None, :]), t2=jnp.asarray(t2[None, :]),
                           w2=jnp.asarray(w2).astype(jnp.bfloat16)))
        kp["blocks"].append(kl)
        c = c_final
        if bi < len(p["transitions"]):
            c //= 2
    # transitions
    kp["transitions"] = []
    for tp in p["transitions"]:
        s, t = _bn_scale_shift(tp["norm"])
        kp["transitions"].append(dict(s=jnp.asarray(s[None, :]),
                                      t=jnp.asarray(t[None, :]),
                                      w=jnp.asarray(tp["conv"][0, 0]).astype(jnp.bfloat16)))
    # head (classifier lane-padded 10 -> 128)
    s5, t5 = _bn_scale_shift(p["norm5"])
    kp["norm5_s"] = jnp.asarray(s5[None, :])
    kp["norm5_t"] = jnp.asarray(t5[None, :])
    wc = jnp.asarray(p["classifier_w"]).astype(jnp.bfloat16)
    kp["cls_w"] = jnp.pad(wc, ((0, 0), (0, HEAD_PAD - NUM_CLASSES)))
    bc = np.zeros((1, HEAD_PAD), np.float32); bc[0, :NUM_CLASSES] = p["classifier_b"]
    kp["cls_b"] = jnp.asarray(bc)
    return kp


# --------------------------- pure-JAX (XLA) reference forward ------------------------
def _ref_bn(x, bn):
    inv = bn["gamma"] / np.sqrt(bn["var"] + BN_EPS)
    return (x - bn["mean"]) * inv + bn["beta"]


def _ref_conv(x, w_hwio, stride, pad):
    return lax.conv_general_dilated(
        x.astype(jnp.bfloat16), jnp.asarray(w_hwio).astype(jnp.bfloat16),
        window_strides=(stride, stride), padding=((pad, pad), (pad, pad)),
        dimension_numbers=("NHWC", "HWIO", "NHWC"),
        preferred_element_type=jnp.float32)


def _ref_1x1(x, w_hwio):
    w = jnp.asarray(w_hwio[0, 0]).astype(jnp.bfloat16)
    return jnp.einsum("bhwc,cd->bhwd", x.astype(jnp.bfloat16), w,
                      preferred_element_type=jnp.float32)


def reference_forward(x_nchw, p):
    x = jnp.transpose(x_nchw, (0, 2, 3, 1)).astype(jnp.float32)
    h = _ref_conv(x, p["conv0"], 2, 3)
    h = jnp.maximum(_ref_bn(h, p["norm0"]), 0.0)
    h = lax.reduce_window(h, -jnp.inf, lax.max, (1, 3, 3, 1), (1, 2, 2, 1),
                          padding=((0, 0), (1, 1), (1, 1), (0, 0)))
    feats = [h]
    for bi, layers in enumerate(p["blocks"]):
        for lp in layers:
            xcat = jnp.concatenate(feats, axis=-1)
            a = jnp.maximum(_ref_bn(xcat, lp["norm1"]), 0.0)
            bott = _ref_1x1(a, lp["conv1"])
            a2 = jnp.maximum(_ref_bn(bott, lp["norm2"]), 0.0)
            feats.append(_ref_conv(a2, lp["conv2"], 1, 1))
        if bi < len(p["transitions"]):
            tp = p["transitions"][bi]
            xcat = jnp.concatenate(feats, axis=-1)
            a = jnp.maximum(_ref_bn(xcat, tp["norm"]), 0.0)
            y = _ref_1x1(a, tp["conv"])
            y = lax.reduce_window(y, 0.0, lax.add, (1, 2, 2, 1), (1, 2, 2, 1),
                                  padding="VALID") / 4.0
            feats = [y]
    x5 = jnp.concatenate(feats, axis=-1)
    h = jnp.maximum(_ref_bn(x5, p["norm5"]), 0.0)
    pooled = jnp.mean(h, axis=(1, 2))
    wc = jnp.asarray(p["classifier_w"]).astype(jnp.bfloat16)
    return jnp.dot(pooled.astype(jnp.bfloat16), wc,
                   preferred_element_type=jnp.float32) + p["classifier_b"]


# ----------------------------------------- main --------------------------------------
if __name__ == "__main__":
    key = jax.random.PRNGKey(0)
    B, IMG = 2, 32    # smallest spatial size that survives the five stride-2 stages
    x = jax.random.normal(key, (B, 3, IMG, IMG), jnp.float32)

    params = init_densenet201_params(seed=0)
    kparams = prep_kernel_params(params)

    out = jax.block_until_ready(densenet201_forward(x, kparams))
    assert out.shape == (B, NUM_CLASSES)

    ref = jax.block_until_ready(reference_forward(x, params))
    scale = float(jnp.max(jnp.abs(ref))) + 1e-6
    err = float(jnp.max(jnp.abs(out - ref)))
    assert err <= 2e-2 * max(1.0, scale), f"mismatch: err={err}, ref_scale={scale}"

    print("KERNEL_OK")
</pallas_src>

<mosaic_0001>
module attributes {stable_mosaic.version = 11 : i64} {
  func.func @_matmul_bn_relu_kernel(%arg0: i32, %arg1: memref<128x256xf32, #tpu.memory_space<vmem>>, %arg2: memref<256x64xbf16, #tpu.memory_space<vmem>>, %arg3: memref<1x64xf32, #tpu.memory_space<vmem>>, %arg4: memref<1x64xf32, #tpu.memory_space<vmem>>, %arg5: memref<128x64xf32, #tpu.memory_space<vmem>>) attributes {dimension_semantics = [#tpu.dimension_semantics<parallel>], iteration_bounds = array<i64: 4>, scalar_prefetch = 0 : i64, scratch_operands = 0 : i64, tpu.core_type = #tpu.core_type<tc>, window_params = [{transform_indices = @transform_0, window_bounds = array<i64: 128, 256>}, {pipeline_mode = #tpu.pipeline_mode<synchronous>, transform_indices = @transform_1, window_bounds = array<i64: 256, 64>}, {pipeline_mode = #tpu.pipeline_mode<synchronous>, transform_indices = @transform_2, window_bounds = array<i64: 1, 64>}, {pipeline_mode = #tpu.pipeline_mode<synchronous>, transform_indices = @transform_3, window_bounds = array<i64: 1, 64>}, {transform_indices = @transform_4, window_bounds = array<i64: 128, 64>}]} {
    %c0 = arith.constant 0 : index
    %c0_0 = arith.constant 0 : index
    %0 = vector.load %arg1[%c0, %c0_0] : memref<128x256xf32, #tpu.memory_space<vmem>>, vector<128x256xf32>
    %1 = arith.truncf %0 : vector<128x256xf32> to vector<128x256xbf16>
    %c0_1 = arith.constant 0 : index
    %c0_2 = arith.constant 0 : index
    %2 = vector.load %arg2[%c0_1, %c0_2] : memref<256x64xbf16, #tpu.memory_space<vmem>>, vector<256x64xbf16>
    %cst = arith.constant dense<0.000000e+00> : vector<128x64xf32>
    %3 = tpu.matmul %1, %2, %cst {dimension_numbers = #tpu.dot_dimension_numbers<[1], [0], [0], [1], [0, 0, 1, 1], [], []>} : vector<128x256xbf16>, vector<256x64xbf16>, vector<128x64xf32> -> vector<128x64xf32>
    %c0_3 = arith.constant 0 : index
    %c0_4 = arith.constant 0 : index
    %4 = vector.load %arg3[%c0_3, %c0_4] : memref<1x64xf32, #tpu.memory_space<vmem>>, vector<1x64xf32>
    %5 = vector.broadcast %4 : vector<1x64xf32> to vector<128x64xf32>
    %6 = arith.mulf %3, %5 : vector<128x64xf32>
    %c0_5 = arith.constant 0 : index
    %c0_6 = arith.constant 0 : index
    %7 = vector.load %arg4[%c0_5, %c0_6] : memref<1x64xf32, #tpu.memory_space<vmem>>, vector<1x64xf32>
    %8 = vector.broadcast %7 : vector<1x64xf32> to vector<128x64xf32>
    %9 = arith.addf %6, %8 : vector<128x64xf32>
    %cst_7 = arith.constant 0.000000e+00 : f32
    %10 = vector.broadcast %cst_7 : f32 to vector<128x64xf32>
    %11 = arith.maximumf %9, %10 : vector<128x64xf32>
    %c0_8 = arith.constant 0 : index
    %c0_9 = arith.constant 0 : index
    %12 = vector.load %arg5[%c0_8, %c0_9] : memref<128x64xf32, #tpu.memory_space<vmem>>, vector<128x64xf32>
    tpu.vector_store %arg5[%c0_8, %c0_9], %11 {strides = array<i32>} : memref<128x64xf32, #tpu.memory_space<vmem>>, vector<128x64xf32>,
    return
  }
  func.func @transform_0(%arg0: i32) -> (i32, i32) {
    %c0_i32 = arith.constant 0 : i32
    %c0_i32_0 = arith.constant 0 : i32
    return %arg0, %c0_i32 : i32, i32
  }
  func.func @transform_1(%arg0: i32) -> (i32, i32) {
    %c0_i32 = arith.constant 0 : i32
    %c0_i32_0 = arith.constant 0 : i32
    %c0_i32_1 = arith.constant 0 : i32
    return %c0_i32, %c0_i32_0 : i32, i32
  }
  func.func @transform_2(%arg0: i32) -> (i32, i32) {
    %c0_i32 = arith.constant 0 : i32
    %c0_i32_0 = arith.constant 0 : i32
    %c0_i32_1 = arith.constant 0 : i32
    return %c0_i32, %c0_i32_0 : i32, i32
  }
  func.func @transform_3(%arg0: i32) -> (i32, i32) {
    %c0_i32 = arith.constant 0 : i32
    %c0_i32_0 = arith.constant 0 : i32
    %c0_i32_1 = arith.constant 0 : i32
    return %c0_i32, %c0_i32_0 : i32, i32
  }
  func.func @transform_4(%arg0: i32) -> (i32, i32) {
    %c0_i32 = arith.constant 0 : i32
    %c0_i32_0 = arith.constant 0 : i32
    return %arg0, %c0_i32 : i32, i32
  }
}

</mosaic_0001>

<bundles_post_ra>
// kernel: matmul_bn_relu.1
= control target key start
LH: loop header
LB: loop body
LE: loop exit
PB: predicated region body
PF: predicated region fallthrough
CT: control target
= control target key end

     0   :  { %9 = vsyncpa [#allocation3], 0  ;;  %s1134_s0 = inlined_call_operand.hbm [shape: f32[512,256], index: 0, kind: input, shape index: {}]   ;;  %s1135_s1 = inlined_call_operand.vmem [shape: bf16[256,64], index: 1, kind: input, shape index: {}]   ;;  %s1136_s2 = inlined_call_operand.vmem [shape: f32[1,64], index: 2, kind: input, shape index: {}]   ;;  %s1137_s3 = inlined_call_operand.vmem [shape: f32[1,64], index: 3, kind: input, shape index: {}]   ;;  %s1138_s4 = inlined_call_operand.vmem [shape: f32[512,64], index: 4, kind: output, shape index: {}]  }
   0x1   :  { %11 = vsyncpa [#allocation3 + $0x1], 0  ;;  %s885_s15 = smov 0   ;;  %s887_s16 = smov 0  }
   0x2   :  { %s889_s17 = smov 0   ;;  %s891_s18 = smov 0  }
   0x3 LB: > { %s637_s19 = sadd.s32 4294967295, %s856_s18   ;;  %s905_s20 = sadd.s32 1, %s856_s18   ;;  %s856_s18 = sphi %s891_s18, %s1145_s18   ;;  %s852_s17 = sphi %s889_s17, %s1144_s17   ;;  %s848_s16 = sphi %s887_s16, %s1143_s16   ;;  %s844_s15 = sphi %s885_s15, %s1142_s15  }
   0x4   : > { %s21_s21 = ssub.s32 %s856_s18, %s905_s20  ;;  %s24_s22 = sadd.s32 1, %s852_s17 }
   0x5   : > { %p22_p0 = scmp.eq.s32.totalorder %s21_s21, 0  ;;  %p31_p1 = scmp.ne.s32.totalorder %s852_s17, %s848_s16 }
   0x6   : > { %p32_p2 = scmp.eq.s32.totalorder %s856_s18, 0  ;;  %p37_p3 = scmp.ne.s32.totalorder %s848_s16, %s844_s15 }
   0x7   : > { %s915_s23 = scalar_select %p22_p0, %s852_s17, %s24_s22  }
   0x8   : > { %p917_p4 = por %p32_p2, %p31_p1  ;;  %p38_p5 = scmp.eq.s32.totalorder %s637_s19, 0 }
   0x9   : > { %p755_p6 = scmp.lt.s32.totalorder %s856_s18, 4  ;;  %s159_s26 = sand.u32 1, %s852_s17  }
   0xa   : > { %p924_p7 = por %p38_p5, %p37_p3  ;;  %s641_s27 = sshll.u32 %s159_s26, 8 }
   0xb   : > { %s716_s28 = sshll.u32 %s856_s18, 8  ;;  %s163_s6 = scalar_lea.vmem [#allocation2], %s641_s27 }
   0xc   : > { %s169_s5 = scalar_lea.hbm %s1134_s0, %s716_s28  ;;  %s172_s7 = sshll.u32 %s163_s6, 4  ;;  %s173_s7 = int_to_ptr.vmem [resolvable:$true] %s172_s7 }
   0xd   : > { %s170_s8 = sshll.u32 %s169_s5, 4  ;;  %p935_p8 = pnand %p755_p6, %p917_p4  ;;  %s171_s8 = int_to_ptr.hbm [resolvable:$true] %s170_s8 }
   0xe   : > { %p645_p9 = scmp.ge.s32.totalorder %s856_s18, 1  ;;  %s160_s10 = scalar_lea.sflag [#allocation3], %s159_s26 }
   0xf   : > { %s792_s11 = sshra.s32 %s171_s8, 4  ;;  %p796_p11 = pneg %p935_p8  ;;  %s793_s11 = int_to_ptr.hbm [resolvable:$true] %s792_s11 }
  0x10   : > { %s794_s12 = scalar_lea.hbm %s793_s11, 256  ;;  %s799_s15 = scalar_lea.hbm %s1134_s0, 1024 }
  0x11   : > { %p795_p10 = scmp.ne.s32.totalorder %s793_s11, %s794_s12  ;;  %p800_p0 = scmp.lt.s32.totalorder %s793_s11, %s1134_s0 }
  0x12   : > { %p801_p1 = scmp.lt.s32.totalorder %s799_s15, %s794_s12 }
  0x13   : > { %p797_p12 = pnand %p796_p11, %p795_p10 }
  0x14   : > { %p802_p2 = por %p801_p1, %p800_p0 }
  0x15   : > { %p798_p13 = pneg %p797_p12 }
  0x17   : > { %p803_p3 = pnand %p802_p2, %p798_p13 }
  0x19   : > { %806 = shalt.err (!%p803_p3)
}
  0x1a   : > { %s858_s24 = smov 256   ;;  %s859_s26 = smov 16  }
  0x1b   : > { %754 = dma.hbm_to_vmem [thread:$0]  (!%p935_p8), %s171_s8, 4096, %s173_s7, %s160_s10, %s858_s24, %s858_s24, %s859_s26  }
  0x1c   : > { %p180_p4 = scmp.lt.s32.totalorder %s856_s18, 5 }
  0x1e   : > { %p181_p5 = pnand %p645_p9, %p180_p4 }
  0x1f   : > { %s186_s27 = sand.u32 (!%p181_p5), 1, %s848_s16  }
  0x20   : > { %184 = sbr.rel (%p181_p5) target bundleno = 268 (0x10c), region = 36  ;;  %s646_s28 = sshll.u32 (!%p181_p5), %s186_s27, 8 }
  0x21   : > { %s187_s29 = scalar_lea.sflag (!%p181_p5), [#allocation3], %s186_s27  ;;  %s954_s30 = scalar_lea.vmem (!%p181_p5), [#allocation2], %s646_s28 }
  0x25   : > { %839 = dma.done.wait (%p924_p7), %s187_s29, 4096  }
  0x26   : > { %841 = vsyncadd (%p924_p7), %s187_s29, 4294963200  ;;  %v724_v0 = vld [vmem:[%s1135_s1 + $0x38] sm:$0xff]  ;;  %v723_v2 = vld [vmem:[%s1135_s1 + $0x30] sm:$0xff]  ;;  %s647_s22 = sshll.u32 %s637_s19, 4  ;;  %vm553_vm0 = vcmask 523264  }
  0x27   : > { %v732_v1 = vld [vmem:[%s1135_s1 + $0x78] sm:$0xff]  ;;  %399 = vmatpush.bf16.msra.mxu0 %v724_v0  ;;  %733 = vmatpush.bf16.msra.mxu2 %v724_v0  ;;  %v731_v3 = vld [vmem:[%s1135_s1 + $0x70] sm:$0xff]  ;;  %v722_v4 = vld [vmem:[%s1135_s1 + $0x28] sm:$0xff]  ;;  %p218_p6 = scmp.lt.s32.totalorder %s647_s22, 63 }
  0x28   : > { %448 = vmatpush.bf16.msra.mxu1 %v732_v1  ;;  %741 = vmatpush.bf16.msra.mxu3 %v732_v1  ;;  %v730_v5 = vld [vmem:[%s1135_s1 + $0x68] sm:$0xff]  ;;  %v721_v6 = vld [vmem:[%s1135_s1 + $0x20] sm:$0xff]  ;;  %v720_v8 = vld [vmem:[%s1135_s1 + $0x18] sm:$0xff] }
  0x29   : > { %v729_v7 = vld [vmem:[%s1135_s1 + $0x60] sm:$0xff]  ;;  %v728_v9 = vld [vmem:[%s1135_s1 + $0x58] sm:$0xff]  ;;  %v719_v10 = vld [vmem:[%s1135_s1 + $0x10] sm:$0xff]  ;;  %s1147_s22 = smov (!%p218_p6, %s647_s22), 63 }
  0x2a   : > { %v727_v11 = vld [vmem:[%s1135_s1 + $0x50] sm:$0xff]  ;;  %v718_v12 = vld [vmem:[%s1135_s1 + $0x8] sm:$0xff]  ;;  %v717_v14 = vld [vmem:[%s1135_s1] sm:$0xff]  ;;  %s648_s28 = sshll.u32 %s1147_s22, 3 }
  0x2b   : > { %400 = vmatpush.bf16.msra.mxu0 %v723_v2  ;;  %734 = vmatpush.bf16.msra.mxu2 %v723_v2  ;;  %v726_v13 = vld [vmem:[%s1135_s1 + $0x48] sm:$0xff]  ;;  %v725_v15 = vld [vmem:[%s1135_s1 + $0x40] sm:$0xff]  ;;  %v225_v17 = vld [vmem:[%s954_s30 + $0x10] sm:$0xff]  ;;  %s1057_s29 = scalar_lea.vmem %s1138_s4, %s648_s28 }
  0x2c   : > { %449 = vmatpush.bf16.msra.mxu1 %v731_v3  ;;  %742 = vmatpush.bf16.msra.mxu3 %v731_v3  ;;  %v223_v16 = vld [vmem:[%s954_s30] sm:$0xff]  ;;  %v241_v19 = vld [vmem:[%s954_s30 + $0x90] sm:$0xff]  ;;  %v224_v20 = vld [vmem:[%s954_s30 + $0x8] sm:$0xff] }
  0x2d   : > { %v239_v18 = vld [vmem:[%s954_s30 + $0x80] sm:$0xff]  ;;  %v226_v21 = vld [vmem:[%s954_s30 + $0x18] sm:$0xff]  ;;  %v240_v22 = vld [vmem:[%s954_s30 + $0x88] sm:$0xff]  ;;  %v255_v24 = vpack.c.bf16 %v225_v17, %v223_v16 }
  0x2e   : > { %v242_v23 = vld [vmem:[%s954_s30 + $0x98] sm:$0xff]  ;;  %v263_v25 = vpack.c.bf16 %v241_v19, %v239_v18  ;;  %v256_v26 = vpack.c.bf16 %v226_v21, %v224_v20  ;;  %v227_v28 = vld [vmem:[%s954_s30 + $0x20] sm:$0xff]  ;;  %v229_v29 = vld [vmem:[%s954_s30 + $0x30] sm:$0xff] }
  0x2f   : > { %401 = vmatpush.bf16.msra.mxu0 %v722_v4  ;;  %735 = vmatpush.bf16.msra.mxu2 %v722_v4  ;;  %v264_v27 = vpack.c.bf16 %v242_v23, %v240_v22  ;;  %v243_v30 = vld [vmem:[%s954_s30 + $0xa0] sm:$0xff]  ;;  %v245_v31 = vld [vmem:[%s954_s30 + $0xb0] sm:$0xff]  ;;  %v228_v32 = vld [vmem:[%s954_s30 + $0x28] sm:$0xff]  ;;  %v257_v36 = vpack.c.bf16 %v229_v29, %v227_v28 }
  0x30   : > { %450 = vmatpush.bf16.msra.mxu1 %v730_v5  ;;  %743 = vmatpush.bf16.msra.mxu3 %v730_v5  ;;  %v230_v33 = vld [vmem:[%s954_s30 + $0x38] sm:$0xff]  ;;  %v244_v34 = vld [vmem:[%s954_s30 + $0xa8] sm:$0xff]  ;;  %v265_v37 = vpack.c.bf16 %v245_v31, %v243_v30  ;;  %v231_v40 = vld [vmem:[%s954_s30 + $0x40] sm:$0xff] }
  0x31   : > { %v246_v35 = vld [vmem:[%s954_s30 + $0xb8] sm:$0xff]  ;;  %v258_v38 = vpack.c.bf16 %v230_v33, %v228_v32  ;;  %v233_v41 = vld [vmem:[%s954_s30 + $0x50] sm:$0xff]  ;;  %v247_v42 = vld [vmem:[%s954_s30 + $0xc0] sm:$0xff] }
  0x32   : > { %v266_v39 = vpack.c.bf16 %v246_v35, %v244_v34  ;;  %v249_v43 = vld [vmem:[%s954_s30 + $0xd0] sm:$0xff]  ;;  %v232_v44 = vld [vmem:[%s954_s30 + $0x48] sm:$0xff]  ;;  %v234_v45 = vld [vmem:[%s954_s30 + $0x58] sm:$0xff]  ;;  %v259_v48 = vpack.c.bf16 %v233_v41, %v231_v40 }
  0x33   : > { %402 = vmatpush.bf16.msra.mxu0 %v721_v6  ;;  %736 = vmatpush.bf16.msra.mxu2 %v721_v6  ;;  %v248_v46 = vld [vmem:[%s954_s30 + $0xc8] sm:$0xff]  ;;  %v250_v47 = vld [vmem:[%s954_s30 + $0xd8] sm:$0xff]  ;;  %v267_v49 = vpack.c.bf16 %v249_v43, %v247_v42  ;;  %v260_v50 = vpack.c.bf16 %v234_v45, %v232_v44  ;;  %v235_v52 = vld [vmem:[%s954_s30 + $0x60] sm:$0xff] }
  0x34   : > { %451 = vmatpush.bf16.msra.mxu1 %v729_v7  ;;  %744 = vmatpush.bf16.msra.mxu3 %v729_v7  ;;  %v268_v51 = vpack.c.bf16 %v250_v47, %v248_v46  ;;  %v237_v53 = vld [vmem:[%s954_s30 + $0x70] sm:$0xff]  ;;  %v251_v54 = vld [vmem:[%s954_s30 + $0xe0] sm:$0xff]  ;;  %v236_v56 = vld [vmem:[%s954_s30 + $0x68] sm:$0xff] }
  0x35   : > { %v253_v55 = vld [vmem:[%s954_s30 + $0xf0] sm:$0xff]  ;;  %v238_v57 = vld [vmem:[%s954_s30 + $0x78] sm:$0xff]  ;;  %v252_v58 = vld [vmem:[%s954_s30 + $0xe8] sm:$0xff]  ;;  %v261_v60 = vpack.c.bf16 %v237_v53, %v235_v52 }
  0x36   : > { %v254_v59 = vld [vmem:[%s954_s30 + $0xf8] sm:$0xff]  ;;  %v269_v61 = vpack.c.bf16 %v253_v55, %v251_v54  ;;  %v262_v62 = vpack.c.bf16 %v238_v57, %v236_v56  ;;  %v1045_v1 = vld [vmem:[%s1136_s2] ss:$0 sm:$0xff] }
  0x37   : > { %403 = vmatpush.bf16.msra.mxu0 %v720_v8  ;;  %737 = vmatpush.bf16.msra.mxu2 %v720_v8  ;;  %v270_v63 = vpack.c.bf16 %v254_v59, %v252_v58  ;;  %v1050_v4 = vld [vmem:[%s1137_s3] ss:$0 sm:$0xff] }
  0x38   : > { %452 = vmatpush.bf16.msra.mxu1 %v728_v9  ;;  %745 = vmatpush.bf16.msra.mxu3 %v728_v9 }
  0x3b   : > { %404 = vmatpush.bf16.msra.mxu0 %v719_v10  ;;  %738 = vmatpush.bf16.msra.mxu2 %v719_v10 }
  0x3c   : > { %453 = vmatpush.bf16.msra.mxu1 %v727_v11  ;;  %746 = vmatpush.bf16.msra.mxu3 %v727_v11 }
  0x3f   : > { %405 = vmatpush.bf16.msra.mxu0 %v718_v12  ;;  %739 = vmatpush.bf16.msra.mxu2 %v718_v12 }
  0x40   : > { %454 = vmatpush.bf16.msra.mxu1 %v726_v13  ;;  %747 = vmatpush.bf16.msra.mxu3 %v726_v13 }
  0x43   : > { %406 = vmatpush.bf16.msra.mxu0 %v717_v14  ;;  %740 = vmatpush.bf16.msra.mxu2 %v717_v14 }
  0x44   : > { %455 = vmatpush.bf16.msra.mxu1 %v725_v15  ;;  %748 = vmatpush.bf16.msra.mxu3 %v725_v15 }
  0x46   : > { %407 = vmatmul.bf16.vlgmr.msra.gmra.mxu0 %v255_v24  ;;  %427 = vmatmul.bf16.vlgmr.msra.gmra.mxu2 %v263_v25 }
  0x47   : > { %456 = vmatmul.bf16.vlgmr.msra.gmra.mxu1 %v256_v26  ;;  %476 = vmatmul.bf16.vlgmr.msra.gmra.mxu3 %v264_v27 }
  0x56   : > { %412 = vmatmul.bf16.gmra.mxu0 %v257_v36  ;;  %432 = vmatmul.bf16.gmra.mxu2 %v265_v37 }
  0x57   : > { %461 = vmatmul.bf16.gmra.mxu1 %v258_v38  ;;  %481 = vmatmul.bf16.gmra.mxu3 %v266_v39 }
  0x66   : > { %417 = vmatmul.bf16.gmra.mxu0 %v259_v48  ;;  %437 = vmatmul.bf16.gmra.mxu2 %v267_v49 }
  0x67   : > { %466 = vmatmul.bf16.gmra.mxu1 %v260_v50  ;;  %486 = vmatmul.bf16.gmra.mxu3 %v268_v51 }
  0x76   : > { %422 = vmatmul.bf16.gmra.mxu0 %v261_v60  ;;  %442 = vmatmul.bf16.gmra.mxu2 %v269_v61 }
  0x77   : > { %471 = vmatmul.bf16.gmra.mxu1 %v262_v62  ;;  %491 = vmatmul.bf16.gmra.mxu3 %v270_v63 }
  0xc3   : > { %v408_v0 = vpop.f32.mrf.mxu0 }
  0xc4   : > { %v457_v2 = vpop.f32.mrf.mxu1 }
  0xc5   : > { %v458_v3 = vadd.f32 %v457_v2, %v408_v0 }
  0xc7   : > { %v501_v5 = vmul.f32 %v1045_v1, %v458_v3 }
  0xc9   : > { %v521_v6 = vadd.f32 %v1050_v4, %v501_v5  ;;  %v428_v7 = vpop.f32.mrf.mxu2 }
  0xca   : > { %v477_v8 = vpop.f32.mrf.mxu3 }
  0xcb   : > { %v537_v9 = vmax.f32 %v521_v6, 0.0  ;;  %v478_v10 = vadd.f32 %v477_v8, %v428_v7  ;;  %v410_v11 = vpop.f32.mrf.mxu0 }
  0xcc   : > { %v459_v12 = vpop.f32.mrf.mxu1 }
  0xcd   : > { %554 = vst.msk [vmem:[%s1057_s29] sm:$0xff] %vm553_vm0, %v537_v9  ;;  %v509_v13 = vmul.f32 %v1045_v1, %v478_v10  ;;  %v460_v14 = vadd.f32 %v459_v12, %v410_v11 }
  0xcf   : > { %v529_v15 = vadd.f32 %v1050_v4, %v509_v13  ;;  %v502_v16 = vmul.f32 %v1045_v1, %v460_v14 }
  0xd1   : > { %v545_v17 = vmax.f32 %v529_v15, 0.0  ;;  %v522_v18 = vadd.f32 %v1050_v4, %v502_v16  ;;  %v430_v19 = vpop.f32.mrf.mxu2 }
  0xd2   : > { %v479_v20 = vpop.f32.mrf.mxu3 }
  0xd3   : > { %562 = vst.msk [vmem:[%s1057_s29 + $0x40] sm:$0xff] %vm553_vm0, %v545_v17  ;;  %v538_v21 = vmax.f32 %v522_v18, 0.0  ;;  %v480_v22 = vadd.f32 %v479_v20, %v430_v19  ;;  %v413_v23 = vpop.f32.mrf.mxu0 }
  0xd4   : > { %v462_v24 = vpop.f32.mrf.mxu1 }
  0xd5   : > { %555 = vst.msk [vmem:[%s1057_s29 + $0x8] sm:$0xff] %vm553_vm0, %v538_v21  ;;  %v510_v25 = vmul.f32 %v1045_v1, %v480_v22  ;;  %v463_v26 = vadd.f32 %v462_v24, %v413_v23 }
  0xd7   : > { %v530_v27 = vadd.f32 %v1050_v4, %v510_v25  ;;  %v503_v28 = vmul.f32 %v1045_v1, %v463_v26 }
  0xd9   : > { %v546_v29 = vmax.f32 %v530_v27, 0.0  ;;  %v523_v30 = vadd.f32 %v1050_v4, %v503_v28  ;;  %v433_v31 = vpop.f32.mrf.mxu2 }
  0xda   : > { %v482_v32 = vpop.f32.mrf.mxu3 }
  0xdb   : > { %563 = vst.msk [vmem:[%s1057_s29 + $0x48] sm:$0xff] %vm553_vm0, %v546_v29  ;;  %v539_v33 = vmax.f32 %v523_v30, 0.0  ;;  %v483_v34 = vadd.f32 %v482_v32, %v433_v31  ;;  %v415_v35 = vpop.f32.mrf.mxu0 }
  0xdc   : > { %v464_v36 = vpop.f32.mrf.mxu1 }
  0xdd   : > { %556 = vst.msk [vmem:[%s1057_s29 + $0x10] sm:$0xff] %vm553_vm0, %v539_v33  ;;  %v511_v37 = vmul.f32 %v1045_v1, %v483_v34  ;;  %v465_v38 = vadd.f32 %v464_v36, %v415_v35 }
  0xdf   : > { %v531_v39 = vadd.f32 %v1050_v4, %v511_v37  ;;  %v504_v40 = vmul.f32 %v1045_v1, %v465_v38 }
  0xe1   : > { %v547_v41 = vmax.f32 %v531_v39, 0.0  ;;  %v524_v42 = vadd.f32 %v1050_v4, %v504_v40  ;;  %v435_v43 = vpop.f32.mrf.mxu2 }
  0xe2   : > { %v484_v44 = vpop.f32.mrf.mxu3 }
  0xe3   : > { %564 = vst.msk [vmem:[%s1057_s29 + $0x50] sm:$0xff] %vm553_vm0, %v547_v41  ;;  %v540_v45 = vmax.f32 %v524_v42, 0.0  ;;  %v485_v46 = vadd.f32 %v484_v44, %v435_v43  ;;  %v418_v47 = vpop.f32.mrf.mxu0 }
  0xe4   : > { %v467_v48 = vpop.f32.mrf.mxu1 }
  0xe5   : > { %557 = vst.msk [vmem:[%s1057_s29 + $0x18] sm:$0xff] %vm553_vm0, %v540_v45  ;;  %v512_v49 = vmul.f32 %v1045_v1, %v485_v46  ;;  %v468_v50 = vadd.f32 %v467_v48, %v418_v47 }
  0xe7   : > { %v532_v51 = vadd.f32 %v1050_v4, %v512_v49  ;;  %v505_v52 = vmul.f32 %v1045_v1, %v468_v50 }
  0xe9   : > { %v548_v53 = vmax.f32 %v532_v51, 0.0  ;;  %v525_v54 = vadd.f32 %v1050_v4, %v505_v52  ;;  %v438_v55 = vpop.f32.mrf.mxu2 }
  0xea   : > { %v487_v56 = vpop.f32.mrf.mxu3 }
  0xeb   : > { %565 = vst.msk [vmem:[%s1057_s29 + $0x58] sm:$0xff] %vm553_vm0, %v548_v53  ;;  %v541_v57 = vmax.f32 %v525_v54, 0.0  ;;  %v488_v58 = vadd.f32 %v487_v56, %v438_v55  ;;  %v420_v59 = vpop.f32.mrf.mxu0 }
  0xec   : > { %v469_v60 = vpop.f32.mrf.mxu1 }
  0xed   : > { %558 = vst.msk [vmem:[%s1057_s29 + $0x20] sm:$0xff] %vm553_vm0, %v541_v57  ;;  %v513_v61 = vmul.f32 %v1045_v1, %v488_v58  ;;  %v470_v62 = vadd.f32 %v469_v60, %v420_v59 }
  0xef   : > { %v533_v63 = vadd.f32 %v1050_v4, %v513_v61  ;;  %v506_v0 = vmul.f32 %v1045_v1, %v470_v62 }
  0xf1   : > { %v549_v2 = vmax.f32 %v533_v63, 0.0  ;;  %v526_v3 = vadd.f32 %v1050_v4, %v506_v0  ;;  %v440_v5 = vpop.f32.mrf.mxu2 }
  0xf2   : > { %v489_v6 = vpop.f32.mrf.mxu3 }
  0xf3   : > { %566 = vst.msk [vmem:[%s1057_s29 + $0x60] sm:$0xff] %vm553_vm0, %v549_v2  ;;  %v542_v7 = vmax.f32 %v526_v3, 0.0  ;;  %v490_v8 = vadd.f32 %v489_v6, %v440_v5  ;;  %v423_v9 = vpop.f32.mrf.mxu0 }
  0xf4   : > { %v472_v10 = vpop.f32.mrf.mxu1 }
  0xf5   : > { %559 = vst.msk [vmem:[%s1057_s29 + $0x28] sm:$0xff] %vm553_vm0, %v542_v7  ;;  %v514_v11 = vmul.f32 %v1045_v1, %v490_v8  ;;  %v473_v12 = vadd.f32 %v472_v10, %v423_v9 }
  0xf7   : > { %v534_v13 = vadd.f32 %v1050_v4, %v514_v11  ;;  %v507_v14 = vmul.f32 %v1045_v1, %v473_v12 }
  0xf9   : > { %v550_v15 = vmax.f32 %v534_v13, 0.0  ;;  %v527_v16 = vadd.f32 %v1050_v4, %v507_v14  ;;  %v443_v17 = vpop.f32.mrf.mxu2 }
  0xfa   : > { %v492_v18 = vpop.f32.mrf.mxu3 }
  0xfb   : > { %567 = vst.msk [vmem:[%s1057_s29 + $0x68] sm:$0xff] %vm553_vm0, %v550_v15  ;;  %v543_v19 = vmax.f32 %v527_v16, 0.0  ;;  %v493_v20 = vadd.f32 %v492_v18, %v443_v17  ;;  %v425_v21 = vpop.f32.mrf.mxu0 }
  0xfc   : > { %v474_v22 = vpop.f32.mrf.mxu1 }
  0xfd   : > { %560 = vst.msk [vmem:[%s1057_s29 + $0x30] sm:$0xff] %vm553_vm0, %v543_v19  ;;  %v515_v23 = vmul.f32 %v1045_v1, %v493_v20  ;;  %v475_v24 = vadd.f32 %v474_v22, %v425_v21 }
  0xff   : > { %v535_v25 = vadd.f32 %v1050_v4, %v515_v23  ;;  %v508_v26 = vmul.f32 %v1045_v1, %v475_v24 }
 0x101   : > { %v551_v27 = vmax.f32 %v535_v25, 0.0  ;;  %v528_v28 = vadd.f32 %v1050_v4, %v508_v26  ;;  %v445_v29 = vpop.f32.mrf.mxu2 }
 0x102   : > { %v494_v30 = vpop.f32.mrf.mxu3 }
 0x103   : > { %568 = vst.msk [vmem:[%s1057_s29 + $0x70] sm:$0xff] %vm553_vm0, %v551_v27  ;;  %v544_v31 = vmax.f32 %v528_v28, 0.0  ;;  %v495_v32 = vadd.f32 %v494_v30, %v445_v29 }
 0x105   : > { %561 = vst.msk [vmem:[%s1057_s29 + $0x38] sm:$0xff] %vm553_vm0, %v544_v31  ;;  %v516_v33 = vmul.f32 %v1045_v1, %v495_v32 }
 0x107   : > { %v536_v34 = vadd.f32 %v1050_v4, %v516_v33 }
 0x109   : > { %v552_v35 = vmax.f32 %v536_v34, 0.0 }
 0x10b   : > { %569 = vst.msk [vmem:[%s1057_s29 + $0x78] sm:$0xff] %vm553_vm0, %v552_v35 }
 0x10c PF: > { %p14_p7 = scmp.ge.s32.totalorder %s905_s20, 6   ;;  %s1142_s15 = smov %s848_s16 }
 0x10d   : > { %s1143_s16 = smov %s852_s17  ;;  %s1144_s17 = smov %s915_s23 }
 0x10e   : > { %s1145_s18 = smov %s905_s20  ;;  %16 = sbr.rel (!%p14_p7) target bundleno = 3 (0x3), region = 76 }
 0x113   :  { %592 = vsyncpa [#allocation3], 1 }
 0x114   :  { %594 = vsyncpa [#allocation3 + $0x1], 1 }

</bundles_post_ra>
